<compile_context>
chip_gen: v5e
topology: v5e:2x2
jax: 0.10.0
libtpu: 0.0.40
codegen_flags: <defaults>
</compile_context>

<pallas_src>
import jax
import jax.numpy as jnp
import numpy as np
from jax.experimental import pallas as pl
from jax.experimental.pallas import tpu as pltpu

EPS = 1e-5
_VMEM_LIMIT = 40 * 1024 * 1024   # leave headroom on v7x's 64 MiB VMEM


def _bn_stats_kernel(x_ref, w_ref, sum_ref, sq_ref):
    # x_ref: (1, Cin, T); w_ref: (Cout, Cin)
    # sum_ref / sq_ref: (Cout, 1) accumulators, resident across the whole grid
    @pl.when(jnp.logical_and(pl.program_id(0) == 0, pl.program_id(1) == 0))
    def _():
        sum_ref[...] = jnp.zeros_like(sum_ref)
        sq_ref[...] = jnp.zeros_like(sq_ref)

    x = x_ref[0]                                                      # (Cin, T)
    y = jnp.dot(w_ref[...], x, preferred_element_type=jnp.float32)    # (Cout, T)
    sum_ref[...] += jnp.sum(y, axis=1, keepdims=True)
    sq_ref[...] += jnp.sum(y * y, axis=1, keepdims=True)


def _bn_apply_kernel(x_ref, w_ref, shift_ref, o_ref):
    # x_ref: (1, Cin, T); w_ref: (Cout, Cin) pre-scaled by gamma*inv_std
    # shift_ref: (Cout, 1); o_ref: (1, Cout, T)
    x = x_ref[0]
    y = jnp.dot(w_ref[...], x, preferred_element_type=jnp.float32)    # (Cout, T)
    o_ref[0] = (y + shift_ref[...]).astype(o_ref.dtype)


def _pick_hw_tile(hw, max_tile=4096):
    """Largest multiple of 128 (<= max_tile) that evenly divides hw."""
    if hw % 128 != 0:
        return hw                      # fall back to a single full-width tile
    for t in (max_tile, 2048, 1024, 512, 256, 128):
        if t <= hw and hw % t == 0:
            return t
    return hw


@jax.jit
def conv_bn(x_nchw, weight_oi, gamma, beta):
    """x_nchw: (N, Cin, H, W); weight_oi: (Cout, Cin) (squeezed (Cout,Cin,1,1)
    conv weight); gamma/beta: (Cout,). Returns (N, Cout, H, W)."""
    n, c_in, h, w = x_nchw.shape
    c_out = weight_oi.shape[0]
    hw = h * w
    t_hw = _pick_hw_tile(hw)
    grid = (n, hw // t_hw)

    x3d = x_nchw.reshape(n, c_in, hw).astype(jnp.float32)   # free reshape, NCHW-native
    w2d = weight_oi.astype(jnp.float32)                     # (Cout, Cin)

    x_spec = pl.BlockSpec((1, c_in, t_hw), lambda i, j: (i, 0, j))
    w_spec = pl.BlockSpec((c_out, c_in), lambda i, j: (0, 0))
    vec_spec = pl.BlockSpec((c_out, 1), lambda i, j: (0, 0))

    # Pass 1: per-channel sum / sum-of-squares of y = W @ x over all N*H*W.
    y_sum, y_sq = pl.pallas_call(
        _bn_stats_kernel,
        out_shape=(jax.ShapeDtypeStruct((c_out, 1), jnp.float32),
                   jax.ShapeDtypeStruct((c_out, 1), jnp.float32)),
        grid=grid,
        in_specs=[x_spec, w_spec],
        out_specs=(vec_spec, vec_spec),
        compiler_params=pltpu.CompilerParams(
            dimension_semantics=("arbitrary", "arbitrary"),
            vmem_limit_bytes=_VMEM_LIMIT),
    )(x3d, w2d)

    # Fold BN statistics into the conv weight + per-channel shift (tiny math).
    cnt = jnp.float32(n * hw)
    mean = y_sum / cnt                                       # (Cout, 1)
    var = jnp.maximum(y_sq / cnt - mean * mean, 0.0)         # biased variance
    inv_std = jax.lax.rsqrt(var + EPS)
    scale = gamma.reshape(c_out, 1).astype(jnp.float32) * inv_std
    shift = beta.reshape(c_out, 1).astype(jnp.float32) - mean * scale
    w_scaled = scale * w2d                                   # (Cout, Cin)

    # Pass 2: out = (gamma*inv_std*W) @ x + shift, written NCHW-native.
    out3d = pl.pallas_call(
        _bn_apply_kernel,
        out_shape=jax.ShapeDtypeStruct((n, c_out, hw), x_nchw.dtype),
        grid=grid,
        in_specs=[x_spec, w_spec, vec_spec],
        out_specs=pl.BlockSpec((1, c_out, t_hw), lambda i, j: (i, 0, j)),
        compiler_params=pltpu.CompilerParams(
            dimension_semantics=("parallel", "parallel"),
            vmem_limit_bytes=_VMEM_LIMIT),
    )(x3d, w_scaled, shift)

    return out3d.reshape(n, c_out, h, w)


def conv_bn_ref(x_nchw, weight_oi, gamma, beta):
    """Plain-JAX reference matching PyTorch Conv2d(1x1, bias=False) +
    BatchNorm2d in training mode."""
    y = jnp.einsum('nihw,oi->nohw', x_nchw.astype(jnp.float32),
                   weight_oi.astype(jnp.float32))
    mean = jnp.mean(y, axis=(0, 2, 3), keepdims=True)
    var = jnp.mean((y - mean) ** 2, axis=(0, 2, 3), keepdims=True)
    y_hat = (y - mean) * jax.lax.rsqrt(var + EPS)
    return y_hat * gamma.reshape(1, -1, 1, 1) + beta.reshape(1, -1, 1, 1)


if __name__ == "__main__":
    N, C_IN, C_OUT, H, W = 2, 4, 8, 16, 16

    key = jax.random.PRNGKey(0)
    kx, kw, kg, kb = jax.random.split(key, 4)

    x = jax.random.normal(kx, (N, C_IN, H, W), dtype=jnp.float32)
    # Conv2d weight shape is (Cout, Cin, 1, 1); keep the squeezed (Cout, Cin).
    weight = jax.random.normal(kw, (C_OUT, C_IN), dtype=jnp.float32) * 0.1
    gamma = 1.0 + 0.1 * jax.random.normal(kg, (C_OUT,), dtype=jnp.float32)
    beta = 0.1 * jax.random.normal(kb, (C_OUT,), dtype=jnp.float32)

    out = conv_bn(x, weight, gamma, beta)
    out = jax.block_until_ready(out)

    ref = conv_bn_ref(x, weight, gamma, beta)
    np.testing.assert_allclose(np.asarray(out), np.asarray(ref),
                               rtol=1e-5, atol=2e-5)

    print("KERNEL_OK")
</pallas_src>

<mosaic_0001>
module attributes {stable_mosaic.version = 11 : i64} {
  func.func @_bn_stats_kernel(%arg0: i32, %arg1: i32, %arg2: memref<1x4x256xf32, #tpu.memory_space<vmem>>, %arg3: memref<8x4xf32, #tpu.memory_space<vmem>>, %arg4: memref<8x1xf32, #tpu.memory_space<vmem>>, %arg5: memref<8x1xf32, #tpu.memory_space<vmem>>) attributes {dimension_semantics = [#tpu.dimension_semantics<arbitrary>, #tpu.dimension_semantics<arbitrary>], iteration_bounds = array<i64: 2, 1>, scalar_prefetch = 0 : i64, scratch_operands = 0 : i64, tpu.core_type = #tpu.core_type<tc>, window_params = [{transform_indices = @transform_0, window_bounds = array<i64: 1, 4, 256>}, {pipeline_mode = #tpu.pipeline_mode<synchronous>, transform_indices = @transform_1, window_bounds = array<i64: 8, 4>}, {pipeline_mode = #tpu.pipeline_mode<synchronous>, transform_indices = @transform_2, window_bounds = array<i64: 8, 1>}, {pipeline_mode = #tpu.pipeline_mode<synchronous>, transform_indices = @transform_3, window_bounds = array<i64: 8, 1>}]} {
    %c0_i32 = arith.constant 0 : i32
    %0 = arith.cmpi eq, %arg0, %c0_i32 : i32
    %c0_i32_0 = arith.constant 0 : i32
    %1 = arith.cmpi eq, %arg1, %c0_i32_0 : i32
    %2 = arith.andi %0, %1 : i1
    %3 = arith.extui %2 : i1 to i32
    %c0_i32_1 = arith.constant 0 : i32
    %4 = arith.cmpi ne, %3, %c0_i32_1 : i32
    scf.if %4 {
      %cst_16 = arith.constant 0.000000e+00 : f32
      %20 = vector.broadcast %cst_16 : f32 to vector<8x1xf32>
      %c0_17 = arith.constant 0 : index
      %c0_18 = arith.constant 0 : index
      %21 = vector.load %arg4[%c0_17, %c0_18] : memref<8x1xf32, #tpu.memory_space<vmem>>, vector<8x1xf32>
      tpu.vector_store %arg4[%c0_17, %c0_18], %20 {strides = array<i32>} : memref<8x1xf32, #tpu.memory_space<vmem>>, vector<8x1xf32>,
      %cst_19 = arith.constant 0.000000e+00 : f32
      %22 = vector.broadcast %cst_19 : f32 to vector<8x1xf32>
      %c0_20 = arith.constant 0 : index
      %c0_21 = arith.constant 0 : index
      %23 = vector.load %arg5[%c0_20, %c0_21] : memref<8x1xf32, #tpu.memory_space<vmem>>, vector<8x1xf32>
      tpu.vector_store %arg5[%c0_20, %c0_21], %22 {strides = array<i32>} : memref<8x1xf32, #tpu.memory_space<vmem>>, vector<8x1xf32>,
    } else {
    }
    %c0 = arith.constant 0 : index
    %c0_2 = arith.constant 0 : index
    %c0_3 = arith.constant 0 : index
    %5 = vector.load %arg2[%c0, %c0_2, %c0_3] : memref<1x4x256xf32, #tpu.memory_space<vmem>>, vector<1x4x256xf32>
    %6 = vector.shape_cast %5 : vector<1x4x256xf32> to vector<4x256xf32>
    %c0_4 = arith.constant 0 : index
    %c0_5 = arith.constant 0 : index
    %7 = vector.load %arg3[%c0_4, %c0_5] : memref<8x4xf32, #tpu.memory_space<vmem>>, vector<8x4xf32>
    %cst = arith.constant dense<0.000000e+00> : vector<8x256xf32>
    %8 = tpu.matmul %7, %6, %cst {dimension_numbers = #tpu.dot_dimension_numbers<[1], [0], [0], [1], [0, 0, 1, 1], [], []>} : vector<8x4xf32>, vector<4x256xf32>, vector<8x256xf32> -> vector<8x256xf32>
    %c0_6 = arith.constant 0 : index
    %c0_7 = arith.constant 0 : index
    %9 = vector.load %arg4[%c0_6, %c0_7] : memref<8x1xf32, #tpu.memory_space<vmem>>, vector<8x1xf32>
    %cst_8 = arith.constant dense<0.000000e+00> : vector<8xf32>
    %10 = vector.multi_reduction <add>, %8, %cst_8 [1] : vector<8x256xf32> to vector<8xf32>
    %11 = vector.shape_cast %10 : vector<8xf32> to vector<8x1xf32>
    %12 = arith.addf %9, %11 : vector<8x1xf32>
    %c0_9 = arith.constant 0 : index
    %c0_10 = arith.constant 0 : index
    %13 = vector.load %arg4[%c0_9, %c0_10] : memref<8x1xf32, #tpu.memory_space<vmem>>, vector<8x1xf32>
    tpu.vector_store %arg4[%c0_9, %c0_10], %12 {strides = array<i32>} : memref<8x1xf32, #tpu.memory_space<vmem>>, vector<8x1xf32>,
    %c0_11 = arith.constant 0 : index
    %c0_12 = arith.constant 0 : index
    %14 = vector.load %arg5[%c0_11, %c0_12] : memref<8x1xf32, #tpu.memory_space<vmem>>, vector<8x1xf32>
    %15 = arith.mulf %8, %8 : vector<8x256xf32>
    %cst_13 = arith.constant dense<0.000000e+00> : vector<8xf32>
    %16 = vector.multi_reduction <add>, %15, %cst_13 [1] : vector<8x256xf32> to vector<8xf32>
    %17 = vector.shape_cast %16 : vector<8xf32> to vector<8x1xf32>
    %18 = arith.addf %14, %17 : vector<8x1xf32>
    %c0_14 = arith.constant 0 : index
    %c0_15 = arith.constant 0 : index
    %19 = vector.load %arg5[%c0_14, %c0_15] : memref<8x1xf32, #tpu.memory_space<vmem>>, vector<8x1xf32>
    tpu.vector_store %arg5[%c0_14, %c0_15], %18 {strides = array<i32>} : memref<8x1xf32, #tpu.memory_space<vmem>>, vector<8x1xf32>,
    return
  }
  func.func @transform_0(%arg0: i32, %arg1: i32) -> (i32, i32, i32) {
    %c0_i32 = arith.constant 0 : i32
    %c0_i32_0 = arith.constant 0 : i32
    return %arg0, %c0_i32, %arg1 : i32, i32, i32
  }
  func.func @transform_1(%arg0: i32, %arg1: i32) -> (i32, i32) {
    %c0_i32 = arith.constant 0 : i32
    %c0_i32_0 = arith.constant 0 : i32
    %c0_i32_1 = arith.constant 0 : i32
    return %c0_i32, %c0_i32_0 : i32, i32
  }
  func.func @transform_2(%arg0: i32, %arg1: i32) -> (i32, i32) {
    %c0_i32 = arith.constant 0 : i32
    %c0_i32_0 = arith.constant 0 : i32
    %c0_i32_1 = arith.constant 0 : i32
    return %c0_i32, %c0_i32_0 : i32, i32
  }
  func.func @transform_3(%arg0: i32, %arg1: i32) -> (i32, i32) {
    %c0_i32 = arith.constant 0 : i32
    %c0_i32_0 = arith.constant 0 : i32
    %c0_i32_1 = arith.constant 0 : i32
    return %c0_i32, %c0_i32_0 : i32, i32
  }
}

module attributes {stable_mosaic.version = 11 : i64} {
  func.func @_bn_apply_kernel(%arg0: i32, %arg1: i32, %arg2: memref<1x4x256xf32, #tpu.memory_space<vmem>>, %arg3: memref<8x4xf32, #tpu.memory_space<vmem>>, %arg4: memref<8x1xf32, #tpu.memory_space<vmem>>, %arg5: memref<1x8x256xf32, #tpu.memory_space<vmem>>) attributes {dimension_semantics = [#tpu.dimension_semantics<parallel>, #tpu.dimension_semantics<parallel>], iteration_bounds = array<i64: 2, 1>, scalar_prefetch = 0 : i64, scratch_operands = 0 : i64, tpu.core_type = #tpu.core_type<tc>, window_params = [{transform_indices = @transform_0, window_bounds = array<i64: 1, 4, 256>}, {pipeline_mode = #tpu.pipeline_mode<synchronous>, transform_indices = @transform_1, window_bounds = array<i64: 8, 4>}, {pipeline_mode = #tpu.pipeline_mode<synchronous>, transform_indices = @transform_2, window_bounds = array<i64: 8, 1>}, {transform_indices = @transform_3, window_bounds = array<i64: 1, 8, 256>}]} {
    %c0 = arith.constant 0 : index
    %c0_0 = arith.constant 0 : index
    %c0_1 = arith.constant 0 : index
    %0 = vector.load %arg2[%c0, %c0_0, %c0_1] : memref<1x4x256xf32, #tpu.memory_space<vmem>>, vector<1x4x256xf32>
    %1 = vector.shape_cast %0 : vector<1x4x256xf32> to vector<4x256xf32>
    %c0_2 = arith.constant 0 : index
    %c0_3 = arith.constant 0 : index
    %2 = vector.load %arg3[%c0_2, %c0_3] : memref<8x4xf32, #tpu.memory_space<vmem>>, vector<8x4xf32>
    %cst = arith.constant dense<0.000000e+00> : vector<8x256xf32>
    %3 = tpu.matmul %2, %1, %cst {dimension_numbers = #tpu.dot_dimension_numbers<[1], [0], [0], [1], [0, 0, 1, 1], [], []>} : vector<8x4xf32>, vector<4x256xf32>, vector<8x256xf32> -> vector<8x256xf32>
    %c0_4 = arith.constant 0 : index
    %c0_5 = arith.constant 0 : index
    %4 = vector.load %arg4[%c0_4, %c0_5] : memref<8x1xf32, #tpu.memory_space<vmem>>, vector<8x1xf32>
    %5 = vector.broadcast %4 : vector<8x1xf32> to vector<8x256xf32>
    %6 = arith.addf %3, %5 : vector<8x256xf32>
    %c0_6 = arith.constant 0 : index
    %c0_7 = arith.constant 0 : index
    %c0_8 = arith.constant 0 : index
    %7 = vector.load %arg5[%c0_6, %c0_7, %c0_8] : memref<1x8x256xf32, #tpu.memory_space<vmem>>, vector<1x8x256xf32>
    %8 = vector.shape_cast %7 : vector<1x8x256xf32> to vector<8x256xf32>
    %9 = vector.shape_cast %6 : vector<8x256xf32> to vector<1x8x256xf32>
    tpu.vector_store %arg5[%c0_6, %c0_7, %c0_8], %9 {strides = array<i32>} : memref<1x8x256xf32, #tpu.memory_space<vmem>>, vector<1x8x256xf32>,
    return
  }
  func.func @transform_0(%arg0: i32, %arg1: i32) -> (i32, i32, i32) {
    %c0_i32 = arith.constant 0 : i32
    %c0_i32_0 = arith.constant 0 : i32
    return %arg0, %c0_i32, %arg1 : i32, i32, i32
  }
  func.func @transform_1(%arg0: i32, %arg1: i32) -> (i32, i32) {
    %c0_i32 = arith.constant 0 : i32
    %c0_i32_0 = arith.constant 0 : i32
    %c0_i32_1 = arith.constant 0 : i32
    return %c0_i32, %c0_i32_0 : i32, i32
  }
  func.func @transform_2(%arg0: i32, %arg1: i32) -> (i32, i32) {
    %c0_i32 = arith.constant 0 : i32
    %c0_i32_0 = arith.constant 0 : i32
    %c0_i32_1 = arith.constant 0 : i32
    return %c0_i32, %c0_i32_0 : i32, i32
  }
  func.func @transform_3(%arg0: i32, %arg1: i32) -> (i32, i32, i32) {
    %c0_i32 = arith.constant 0 : i32
    %c0_i32_0 = arith.constant 0 : i32
    return %arg0, %c0_i32, %arg1 : i32, i32, i32
  }
}

</mosaic_0001>

<bundles_post_ra>
// kernel: conv_bn.2
= control target key start
LH: loop header
LB: loop body
LE: loop exit
PB: predicated region body
PF: predicated region fallthrough
CT: control target
= control target key end

     0   :  { %s394_s12 = smov 0   ;;  %s396_s13 = smov 0   ;;  %s445_s0 = inlined_call_operand.vmem [shape: f32[2,4,256], index: 0, kind: input, shape index: {}]   ;;  %s446_s1 = inlined_call_operand.vmem [shape: f32[8,4], index: 1, kind: input, shape index: {}]   ;;  %s447_s2 = inlined_call_operand.vmem [shape: f32[8,1], index: 2, kind: output, shape index: {0}]   ;;  %s448_s3 = inlined_call_operand.vmem [shape: f32[8,1], index: 3, kind: output, shape index: {1}]  }
   0x1   :  { %s398_s14 = smov 0  }
   0x2 LB: > { %s26_s15 = sadd.s32 1, %s367_s13  ;;  %p312_p0 = scmp.ge.s32.totalorder %s371_s14, 1  ;;  %s371_s14 = sphi %s398_s14, %s14_s14   ;;  %s367_s13 = sphi %s396_s13, %s450_s13   ;;  %s363_s12 = sphi %s394_s12, %s449_s12  }
   0x3   : > { %p28_p1 = scmp.ge.s32.totalorder %s26_s15, 2  ;;  %p149_p2 = scmp.lt.s32.totalorder %s371_s14, 3 }
   0x5   : > { %s452_s15 = smov (%p28_p1, %s26_s15), 0  ;;  %p150_p3 = pnand %p312_p0, %p149_p2 }
   0x6   : > { %p173_p4 = scmp.lt.s32.totalorder (!%p150_p3), %s363_s12, 1  ;;  %p182_p5 = scmp.eq.s32.totalorder (!%p150_p3), %s363_s12, 0 }
   0x7   : > { %153 = sbr.rel (%p150_p3) target bundleno = 282 (0x11a), region = 28 }
   0xc   : > { %s454_s12 = smov (!%p173_p4, %s363_s12), 1  ;;  %187 = sbr.rel (!%p182_p5) target bundleno = 17 (0x11), region = 32  ;;  %vm188_vm0 = vcmask (%p182_p5), 7168   ;;  %v373_v0 = vmov (%p182_p5), 0.0  }
   0xd   : > { %s322_s16 = sshll.u32 %s454_s12, 3  ;;  %189 = vst.msk [vmem:[%s447_s2] sm:$0xff] (%p182_p5), %vm188_vm0, %v373_v0 }
   0xe   : > { %s180_s19 = scalar_lea.vmem %s445_s0, %s322_s16  ;;  %190 = vst.msk [vmem:[%s448_s3] sm:$0xff] (%p182_p5), %vm188_vm0, %v373_v0 }
  0x11 PF: > { %v191_v1 = vld [vmem:[%s180_s19] sm:$0xff]  ;;  %vm201_vm1 = vcmask 1043456   ;;  %vm197_vm2 = vcmask 31744   ;;  %vm251_vm3 = vcmask 7168  }
  0x12   : > { %194 = vst [vmem:[#allocation1] ss:$2 sm:$0xff] %v191_v1  ;;  %v192_v2 = vld [vmem:[%s446_s1] sm:$0xff] }
  0x14   : > { %v246_v11 = vld [vmem:[%s447_s2] sm:$0xff] }
  0x15   : > { %v253_v14 = vld [vmem:[%s448_s3] sm:$0xff] }
  0x19   : > { %v195_v3 = vld.sshfl [vmem:[#allocation1] sm:$0xff pattern:$0x75316420]  ;;  %v196_v4 = vld.sshfl [vmem:[#allocation1 + $0x8] sm:$0xff pattern:$0x75316420] }
  0x1a   : > { %316 = vmatpush.msk.msra.mxu0 %vm201_vm1, %v195_v3  ;;  %318 = vmatpush.msk.msra.mxu1 %vm201_vm1, %v196_v4 }
  0x1b   : > { %317 = vmatmul.msk.f32.vlgmr.msra.gmra.mxu0 %vm197_vm2, %v192_v2  ;;  %319 = vmatmul.msk.f32.vlgmr.msra.gmra.mxu1 %vm197_vm2, %v192_v2 }
  0x98   : > { %v223_v5 = vpop.f32.mrf.mxu0  ;;  %v243_v6 = vpop.f32.mrf.mxu1 }
  0x99   : > { %v247_v7 = vadd.f32 %v243_v6, %v223_v5  ;;  %v254_v8 = vmul.f32 %v223_v5, %v223_v5  ;;  %v255_v9 = vmul.f32 %v243_v6, %v243_v6 }
  0x9b   : > { %248 = vadd.xlane.f32.xlu0 %v247_v7  ;;  %v256_v10 = vadd.f32 %v255_v9, %v254_v8 }
  0xa3   : > { %257 = vadd.xlane.f32.xlu0 %v256_v10 }
 0x10e   : > { %v249_v12 = vpop.xlane.xlu0 %248 }
 0x10f   : > { %v250_v13 = vadd.f32 %v249_v12, %v246_v11 }
 0x111   : > { %252 = vst.msk [vmem:[%s447_s2] sm:$0xff] %vm251_vm3, %v250_v13 }
 0x116   : > { %v258_v15 = vpop.xlane.xlu0 %257 }
 0x117   : > { %v259_v16 = vadd.f32 %v258_v15, %v253_v14 }
 0x119   : > { %260 = vst.msk [vmem:[%s448_s3] sm:$0xff] %vm251_vm3, %v259_v16 }
 0x11a PF: > { %s14_s14 = sadd.s32 1, %s371_s14   ;;  %s449_s12 = smov %s367_s13 }
 0x11b   : > { %p11_p6 = scmp.ge.s32.totalorder %s14_s14, 4   ;;  %s450_s13 = smov %s452_s15 }
 0x11d   :  { %13 = sbr.rel (!%p11_p6) target bundleno = 2 (0x2), region = 66 }

// kernel: conv_bn.3
= control target key start
LH: loop header
LB: loop body
LE: loop exit
PB: predicated region body
PF: predicated region fallthrough
CT: control target
= control target key end

     0   :  { %s448_s12 = smov 0   ;;  %s450_s13 = smov 0   ;;  %s487_s0 = inlined_call_operand.vmem [shape: f32[2,4,256], index: 0, kind: input, shape index: {}]   ;;  %s488_s1 = inlined_call_operand.vmem [shape: f32[8,4], index: 1, kind: input, shape index: {}]   ;;  %s489_s2 = inlined_call_operand.vmem [shape: f32[8,1], index: 2, kind: input, shape index: {}]   ;;  %s490_s3 = inlined_call_operand.vmem [shape: f32[2,8,256], index: 3, kind: output, shape index: {}]  }
   0x1   :  { %s452_s14 = smov 0  }
   0x2 LB: > { %s25_s15 = sadd.s32 1, %s421_s13  ;;  %p364_p0 = scmp.ge.s32.totalorder %s425_s14, 1  ;;  %s425_s14 = sphi %s452_s14, %s13_s14   ;;  %s421_s13 = sphi %s450_s13, %s492_s13   ;;  %s417_s12 = sphi %s448_s12, %s491_s12  }
   0x3   : > { %p27_p1 = scmp.ge.s32.totalorder %s25_s15, 2  ;;  %p158_p2 = scmp.lt.s32.totalorder %s425_s14, 3 }
   0x5   : > { %s494_s15 = smov (%p27_p1, %s25_s15), 0  ;;  %p159_p3 = pnand %p364_p0, %p158_p2 }
   0x6   : > { %p191_p4 = scmp.lt.s32.totalorder (!%p159_p3), %s417_s12, 1 }
   0x7   : > { %162 = sbr.rel (%p159_p3) target bundleno = 155 (0x9b), region = 32 }
   0xc   : > { %v212_v0 = vld [vmem:[%s489_s2] sm:$0xff]  ;;  %v427_v1 = vmov 0   ;;  %s496_s12 = smov (!%p191_p4, %s417_s12), 1  ;;  %vm226_vm0 = vcmask 1043456   ;;  %vm222_vm1 = vcmask 31744  }
   0xd   : > { %402 = vset.pattern.permute.xlu0 %v427_v1  ;;  %s375_s18 = sshll.u32 %s496_s12, 3  ;;  %v211_v3 = vld [vmem:[%s488_s1] sm:$0xff]  ;;  %s376_s24 = sshll.u32 %s496_s12, 4 }
   0xe   : > { %215 = vperm.xlu0 %402, %v212_v0   ;;  %s198_s21 = scalar_lea.vmem %s487_s0, %s375_s18  ;;  %s208_s27 = scalar_lea.vmem %s490_s3, %s376_s24 }
   0xf   : > { %v210_v2 = vld [vmem:[%s198_s21] sm:$0xff] }
  0x10   : > { %219 = vst [vmem:[#allocation1] ss:$2 sm:$0xff] %v210_v2 }
  0x17   : > { %v220_v4 = vld.sshfl [vmem:[#allocation1] sm:$0xff pattern:$0x75316420]  ;;  %v221_v5 = vld.sshfl [vmem:[#allocation1 + $0x8] sm:$0xff pattern:$0x75316420] }
  0x18   : > { %369 = vmatpush.msk.msra.mxu0 %vm226_vm0, %v220_v4  ;;  %371 = vmatpush.msk.msra.mxu1 %vm226_vm0, %v221_v5 }
  0x19   : > { %370 = vmatmul.msk.f32.vlgmr.msra.gmra.mxu0 %vm222_vm1, %v211_v3  ;;  %372 = vmatmul.msk.f32.vlgmr.msra.gmra.mxu1 %vm222_vm1, %v211_v3 }
  0x80   : > { %v216_v6 = vpop.permute.xlu0 %215 }
  0x96   : > { %v248_v7 = vpop.f32.mrf.mxu0  ;;  %v268_v8 = vpop.f32.mrf.mxu1 }
  0x97   : > { %v249_v9 = vadd.f32 %v248_v7, %v216_v6  ;;  %v269_v10 = vadd.f32 %v268_v8, %v216_v6 }
  0x99   : > { %271 = vst [vmem:[%s208_s27] sm:$0xff] %v249_v9 }
  0x9a   : > { %272 = vst [vmem:[%s208_s27 + $0x8] sm:$0xff] %v269_v10 }
  0x9b PF: > { %s13_s14 = sadd.s32 1, %s425_s14   ;;  %s491_s12 = smov %s421_s13 }
  0x9c   : > { %p10_p5 = scmp.ge.s32.totalorder %s13_s14, 4   ;;  %s492_s13 = smov %s494_s15 }
  0x9e   :  { %12 = sbr.rel (!%p10_p5) target bundleno = 2 (0x2), region = 62 }

</bundles_post_ra>
